<compile_context>
chip_gen: v5e
topology: v5e:2x2
jax: 0.10.0
libtpu: 0.0.40
codegen_flags: <defaults>
</compile_context>

<pallas_src>
import math

import jax
import jax.numpy as jnp
from jax import lax
from jax.experimental import pallas as pl
from jax.experimental.pallas import tpu as pltpu


# ----------------------------- configuration ------------------------------ #
BS = 2          # batch
QLEN = 8        # sequence length
DIM = 32        # model dim
N_HEADS = 4
DPH = DIM // N_HEADS  # dim per head


# ------------------------------- kernel ----------------------------------- #
def mha_kernel(x_ref, wqkv_ref, bqkv_ref, wo_ref, bo_ref, o_ref):
    """One grid step = one batch: fused QKV proj + per-head attention + fused out proj.

    x_ref    : (QLEN, DIM)      tokens of this batch
    wqkv_ref : (DIM, 3*DIM)     packed [Wq*scale | Wk | Wv]
    bqkv_ref : (1, 3*DIM)       packed [bq*scale | bk | bv]
    wo_ref   : (DIM, DIM), bo_ref : (1, DIM)
    o_ref    : (QLEN, DIM)
    """
    x = x_ref[...]                                                   # (QLEN, DIM)

    # Fused QKV projection (single MXU op) + packed bias add.
    qkv = jnp.dot(x, wqkv_ref[...],
                  preferred_element_type=jnp.float32) + bqkv_ref[...]

    # 1/sqrt(dim_per_head) already folded into Wq/bq wrapper-side.
    q = qkv[:, 0:DIM]
    k = qkv[:, DIM:2 * DIM]
    v = qkv[:, 2 * DIM:3 * DIM]

    # Per-head scaled dot-product attention (static unroll) with the output
    # projection fused in: acc accumulates (p @ v_h) @ Wo[lo:hi, :].
    acc = jnp.zeros((QLEN, DIM), jnp.float32)
    for h in range(N_HEADS):
        lo = h * DPH
        qh = q[:, lo:lo + DPH]                                       # (QLEN, DPH)
        kh = k[:, lo:lo + DPH]
        vh = v[:, lo:lo + DPH]

        # scores = qh @ kh^T without materializing kh.T (no XLU transpose).
        s = lax.dot_general(qh, kh,
                            dimension_numbers=(((1,), (1,)), ((), ())),
                            preferred_element_type=jnp.float32)      # (QLEN, QLEN)
        # softmax over klen (last axis) in float32
        s = s - jnp.max(s, axis=-1, keepdims=True)
        p = jnp.exp(s)
        p = p * pl.reciprocal(jnp.sum(p, axis=-1, keepdims=True))

        ctx_h = jnp.dot(p, vh, preferred_element_type=jnp.float32)   # (QLEN, DPH)
        # Wo sliced at an 8-aligned sublane offset: free static Ref-view slice.
        acc = acc + jnp.dot(ctx_h, wo_ref[lo:lo + DPH, :],
                            preferred_element_type=jnp.float32)

    o_ref[...] = acc + bo_ref[...]


# ------------------------------- wrapper ----------------------------------- #
def multi_head_attention(x, wq, bq, wk, bk, wv, bv, wo, bo):
    bs, qlen, dim = x.shape
    rows = bs * qlen
    scale = 1.0 / math.sqrt(dim // N_HEADS)

    # Wrapper-side (XLA) packing: fold the q-scale into Wq/bq, fuse QKV
    # weights/biases, flatten the batch.
    w_qkv = jnp.concatenate([wq * scale, wk, wv], axis=1)            # (dim, 3*dim)
    b_qkv = jnp.concatenate([bq * scale, bk, bv], axis=1)            # (1, 3*dim)
    x_flat = x.reshape(rows, dim)                                    # (bs*qlen, dim)

    out_flat = pl.pallas_call(
        mha_kernel,
        out_shape=jax.ShapeDtypeStruct((rows, dim), jnp.float32),
        grid_spec=pltpu.PrefetchScalarGridSpec(
            num_scalar_prefetch=0,
            grid=(bs,),                                              # parallel over batch
            in_specs=[
                pl.BlockSpec((qlen, dim), lambda b: (b, 0)),         # x rows of batch b
                pl.BlockSpec((dim, 3 * dim), lambda b: (0, 0)),      # W_qkv packed
                pl.BlockSpec((1, 3 * dim), lambda b: (0, 0)),        # b_qkv packed
                pl.BlockSpec((dim, dim), lambda b: (0, 0)),          # Wo
                pl.BlockSpec((1, dim), lambda b: (0, 0)),            # bo
            ],
            out_specs=pl.BlockSpec((qlen, dim), lambda b: (b, 0)),
        ),
        compiler_params=pltpu.CompilerParams(
            dimension_semantics=("parallel",)),                      # megacore on v7x
    )(x_flat, w_qkv, b_qkv, wo, bo)

    return out_flat.reshape(bs, qlen, dim)


# --------------------------- pure-JAX reference ---------------------------- #
def reference(x, wq, bq, wk, bk, wv, bv, wo, bo):
    bs, qlen, dim = x.shape
    def proj(x_, w, b):
        y = x_ @ w + b[None, :, :]                                   # (bs, qlen, dim)
        return y.reshape(bs, qlen, N_HEADS, DPH).transpose(0, 2, 1, 3)
    q = proj(x, wq, bq) / math.sqrt(DPH)
    k = proj(x, wk, bk)
    v = proj(x, wv, bv)
    scores = jnp.einsum("bhqd,bhkd->bhqk", q, k)
    weights = jax.nn.softmax(scores.astype(jnp.float32), axis=-1)
    ctx = jnp.einsum("bhqk,bhkd->bhqd", weights, v)
    ctx = ctx.transpose(0, 2, 1, 3).reshape(bs, qlen, dim)
    return ctx @ wo + bo[None, :, :]


# --------------------------------- main ------------------------------------ #
if __name__ == "__main__":
    key = jax.random.PRNGKey(0)
    keys = jax.random.split(key, 9)

    # Deterministic "checkpoint-free" parameter init (PyTorch Linear-like scale).
    lim = 1.0 / math.sqrt(DIM)
    def unif(k, shape):
        return jax.random.uniform(k, shape, jnp.float32, -lim, lim)

    x  = jax.random.normal(keys[0], (BS, QLEN, DIM), jnp.float32)
    wq = unif(keys[1], (DIM, DIM)); bq = unif(keys[2], (1, DIM))
    wk = unif(keys[3], (DIM, DIM)); bk = unif(keys[4], (1, DIM))
    wv = unif(keys[5], (DIM, DIM)); bv = unif(keys[6], (1, DIM))
    wo = unif(keys[7], (DIM, DIM)); bo = unif(keys[8], (1, DIM))

    out = multi_head_attention(x, wq, bq, wk, bk, wv, bv, wo, bo)
    out = jax.block_until_ready(out)

    ref = reference(x, wq, bq, wk, bk, wv, bv, wo, bo)
    assert out.shape == (BS, QLEN, DIM)
    assert jnp.allclose(out, ref, rtol=1e-5, atol=1e-5), \
        f"max abs err {jnp.max(jnp.abs(out - ref))}"

    print("KERNEL_OK")
</pallas_src>

<mosaic_0001>
module attributes {stable_mosaic.version = 11 : i64} {
  func.func @mha_kernel(%arg0: i32, %arg1: memref<8x32xf32, #tpu.memory_space<vmem>>, %arg2: memref<32x96xf32, #tpu.memory_space<vmem>>, %arg3: memref<1x96xf32, #tpu.memory_space<vmem>>, %arg4: memref<32x32xf32, #tpu.memory_space<vmem>>, %arg5: memref<1x32xf32, #tpu.memory_space<vmem>>, %arg6: memref<8x32xf32, #tpu.memory_space<vmem>>) attributes {dimension_semantics = [#tpu.dimension_semantics<parallel>], iteration_bounds = array<i64: 2>, scalar_prefetch = 0 : i64, scratch_operands = 0 : i64, tpu.core_type = #tpu.core_type<tc>, window_params = [{transform_indices = @transform_0, window_bounds = array<i64: 8, 32>}, {pipeline_mode = #tpu.pipeline_mode<synchronous>, transform_indices = @transform_1, window_bounds = array<i64: 32, 96>}, {pipeline_mode = #tpu.pipeline_mode<synchronous>, transform_indices = @transform_2, window_bounds = array<i64: 1, 96>}, {pipeline_mode = #tpu.pipeline_mode<synchronous>, transform_indices = @transform_3, window_bounds = array<i64: 32, 32>}, {pipeline_mode = #tpu.pipeline_mode<synchronous>, transform_indices = @transform_4, window_bounds = array<i64: 1, 32>}, {transform_indices = @transform_5, window_bounds = array<i64: 8, 32>}]} {
    %c0 = arith.constant 0 : index
    %c0_0 = arith.constant 0 : index
    %0 = vector.load %arg1[%c0, %c0_0] : memref<8x32xf32, #tpu.memory_space<vmem>>, vector<8x32xf32>
    %c0_1 = arith.constant 0 : index
    %c0_2 = arith.constant 0 : index
    %1 = vector.load %arg2[%c0_1, %c0_2] : memref<32x96xf32, #tpu.memory_space<vmem>>, vector<32x96xf32>
    %cst = arith.constant dense<0.000000e+00> : vector<8x96xf32>
    %2 = tpu.matmul %0, %1, %cst {dimension_numbers = #tpu.dot_dimension_numbers<[1], [0], [0], [1], [0, 0, 1, 1], [], []>} : vector<8x32xf32>, vector<32x96xf32>, vector<8x96xf32> -> vector<8x96xf32>
    %c0_3 = arith.constant 0 : index
    %c0_4 = arith.constant 0 : index
    %3 = vector.load %arg3[%c0_3, %c0_4] : memref<1x96xf32, #tpu.memory_space<vmem>>, vector<1x96xf32>
    %4 = vector.broadcast %3 : vector<1x96xf32> to vector<8x96xf32>
    %5 = arith.addf %2, %4 : vector<8x96xf32>
    %6 = vector.extract_strided_slice %5 {offsets = [0, 0], sizes = [8, 32], strides = [1, 1]} : vector<8x96xf32> to vector<8x32xf32>
    %7 = vector.extract_strided_slice %5 {offsets = [0, 32], sizes = [8, 32], strides = [1, 1]} : vector<8x96xf32> to vector<8x32xf32>
    %8 = vector.extract_strided_slice %5 {offsets = [0, 64], sizes = [8, 32], strides = [1, 1]} : vector<8x96xf32> to vector<8x32xf32>
    %cst_5 = arith.constant 0.000000e+00 : f32
    %9 = vector.broadcast %cst_5 : f32 to vector<8x32xf32>
    %10 = vector.extract_strided_slice %6 {offsets = [0, 0], sizes = [8, 8], strides = [1, 1]} : vector<8x32xf32> to vector<8x8xf32>
    %11 = vector.extract_strided_slice %7 {offsets = [0, 0], sizes = [8, 8], strides = [1, 1]} : vector<8x32xf32> to vector<8x8xf32>
    %12 = vector.extract_strided_slice %8 {offsets = [0, 0], sizes = [8, 8], strides = [1, 1]} : vector<8x32xf32> to vector<8x8xf32>
    %cst_6 = arith.constant dense<0.000000e+00> : vector<8x8xf32>
    %13 = tpu.matmul %10, %11, %cst_6 {dimension_numbers = #tpu.dot_dimension_numbers<[1], [1], [0], [0], [0, 0, 1, 0], [], []>} : vector<8x8xf32>, vector<8x8xf32>, vector<8x8xf32> -> vector<8x8xf32>
    %cst_7 = arith.constant dense<0xFF800000> : vector<8xf32>
    %14 = vector.multi_reduction <maximumf>, %13, %cst_7 [1] : vector<8x8xf32> to vector<8xf32>
    %15 = vector.shape_cast %14 : vector<8xf32> to vector<8x1xf32>
    %16 = vector.broadcast %15 : vector<8x1xf32> to vector<8x8xf32>
    %17 = arith.subf %13, %16 : vector<8x8xf32>
    %18 = math.exp %17 : vector<8x8xf32>
    %cst_8 = arith.constant dense<0.000000e+00> : vector<8xf32>
    %19 = vector.multi_reduction <add>, %18, %cst_8 [1] : vector<8x8xf32> to vector<8xf32>
    %20 = vector.shape_cast %19 : vector<8xf32> to vector<8x1xf32>
    %21 = tpu.reciprocal %20 : vector<8x1xf32> -> vector<8x1xf32>
    %22 = vector.broadcast %21 : vector<8x1xf32> to vector<8x8xf32>
    %23 = arith.mulf %18, %22 : vector<8x8xf32>
    %cst_9 = arith.constant dense<0.000000e+00> : vector<8x8xf32>
    %24 = tpu.matmul %23, %12, %cst_9 {dimension_numbers = #tpu.dot_dimension_numbers<[1], [0], [0], [1], [0, 0, 1, 1], [], []>} : vector<8x8xf32>, vector<8x8xf32>, vector<8x8xf32> -> vector<8x8xf32>
    %c0_10 = arith.constant 0 : index
    %c0_11 = arith.constant 0 : index
    %25 = vector.load %arg4[%c0_10, %c0_11] : memref<32x32xf32, #tpu.memory_space<vmem>>, vector<8x32xf32>
    %cst_12 = arith.constant dense<0.000000e+00> : vector<8x32xf32>
    %26 = tpu.matmul %24, %25, %cst_12 {dimension_numbers = #tpu.dot_dimension_numbers<[1], [0], [0], [1], [0, 0, 1, 1], [], []>} : vector<8x8xf32>, vector<8x32xf32>, vector<8x32xf32> -> vector<8x32xf32>
    %27 = arith.addf %9, %26 : vector<8x32xf32>
    %28 = vector.extract_strided_slice %6 {offsets = [0, 8], sizes = [8, 8], strides = [1, 1]} : vector<8x32xf32> to vector<8x8xf32>
    %29 = vector.extract_strided_slice %7 {offsets = [0, 8], sizes = [8, 8], strides = [1, 1]} : vector<8x32xf32> to vector<8x8xf32>
    %30 = vector.extract_strided_slice %8 {offsets = [0, 8], sizes = [8, 8], strides = [1, 1]} : vector<8x32xf32> to vector<8x8xf32>
    %cst_13 = arith.constant dense<0.000000e+00> : vector<8x8xf32>
    %31 = tpu.matmul %28, %29, %cst_13 {dimension_numbers = #tpu.dot_dimension_numbers<[1], [1], [0], [0], [0, 0, 1, 0], [], []>} : vector<8x8xf32>, vector<8x8xf32>, vector<8x8xf32> -> vector<8x8xf32>
    %cst_14 = arith.constant dense<0xFF800000> : vector<8xf32>
    %32 = vector.multi_reduction <maximumf>, %31, %cst_14 [1] : vector<8x8xf32> to vector<8xf32>
    %33 = vector.shape_cast %32 : vector<8xf32> to vector<8x1xf32>
    %34 = vector.broadcast %33 : vector<8x1xf32> to vector<8x8xf32>
    %35 = arith.subf %31, %34 : vector<8x8xf32>
    %36 = math.exp %35 : vector<8x8xf32>
    %cst_15 = arith.constant dense<0.000000e+00> : vector<8xf32>
    %37 = vector.multi_reduction <add>, %36, %cst_15 [1] : vector<8x8xf32> to vector<8xf32>
    %38 = vector.shape_cast %37 : vector<8xf32> to vector<8x1xf32>
    %39 = tpu.reciprocal %38 : vector<8x1xf32> -> vector<8x1xf32>
    %40 = vector.broadcast %39 : vector<8x1xf32> to vector<8x8xf32>
    %41 = arith.mulf %36, %40 : vector<8x8xf32>
    %cst_16 = arith.constant dense<0.000000e+00> : vector<8x8xf32>
    %42 = tpu.matmul %41, %30, %cst_16 {dimension_numbers = #tpu.dot_dimension_numbers<[1], [0], [0], [1], [0, 0, 1, 1], [], []>} : vector<8x8xf32>, vector<8x8xf32>, vector<8x8xf32> -> vector<8x8xf32>
    %c8 = arith.constant 8 : index
    %c0_17 = arith.constant 0 : index
    %43 = vector.load %arg4[%c8, %c0_17] : memref<32x32xf32, #tpu.memory_space<vmem>>, vector<8x32xf32>
    %cst_18 = arith.constant dense<0.000000e+00> : vector<8x32xf32>
    %44 = tpu.matmul %42, %43, %cst_18 {dimension_numbers = #tpu.dot_dimension_numbers<[1], [0], [0], [1], [0, 0, 1, 1], [], []>} : vector<8x8xf32>, vector<8x32xf32>, vector<8x32xf32> -> vector<8x32xf32>
    %45 = arith.addf %27, %44 : vector<8x32xf32>
    %46 = vector.extract_strided_slice %6 {offsets = [0, 16], sizes = [8, 8], strides = [1, 1]} : vector<8x32xf32> to vector<8x8xf32>
    %47 = vector.extract_strided_slice %7 {offsets = [0, 16], sizes = [8, 8], strides = [1, 1]} : vector<8x32xf32> to vector<8x8xf32>
    %48 = vector.extract_strided_slice %8 {offsets = [0, 16], sizes = [8, 8], strides = [1, 1]} : vector<8x32xf32> to vector<8x8xf32>
    %cst_19 = arith.constant dense<0.000000e+00> : vector<8x8xf32>
    %49 = tpu.matmul %46, %47, %cst_19 {dimension_numbers = #tpu.dot_dimension_numbers<[1], [1], [0], [0], [0, 0, 1, 0], [], []>} : vector<8x8xf32>, vector<8x8xf32>, vector<8x8xf32> -> vector<8x8xf32>
    %cst_20 = arith.constant dense<0xFF800000> : vector<8xf32>
    %50 = vector.multi_reduction <maximumf>, %49, %cst_20 [1] : vector<8x8xf32> to vector<8xf32>
    %51 = vector.shape_cast %50 : vector<8xf32> to vector<8x1xf32>
    %52 = vector.broadcast %51 : vector<8x1xf32> to vector<8x8xf32>
    %53 = arith.subf %49, %52 : vector<8x8xf32>
    %54 = math.exp %53 : vector<8x8xf32>
    %cst_21 = arith.constant dense<0.000000e+00> : vector<8xf32>
    %55 = vector.multi_reduction <add>, %54, %cst_21 [1] : vector<8x8xf32> to vector<8xf32>
    %56 = vector.shape_cast %55 : vector<8xf32> to vector<8x1xf32>
    %57 = tpu.reciprocal %56 : vector<8x1xf32> -> vector<8x1xf32>
    %58 = vector.broadcast %57 : vector<8x1xf32> to vector<8x8xf32>
    %59 = arith.mulf %54, %58 : vector<8x8xf32>
    %cst_22 = arith.constant dense<0.000000e+00> : vector<8x8xf32>
    %60 = tpu.matmul %59, %48, %cst_22 {dimension_numbers = #tpu.dot_dimension_numbers<[1], [0], [0], [1], [0, 0, 1, 1], [], []>} : vector<8x8xf32>, vector<8x8xf32>, vector<8x8xf32> -> vector<8x8xf32>
    %c16 = arith.constant 16 : index
    %c0_23 = arith.constant 0 : index
    %61 = vector.load %arg4[%c16, %c0_23] : memref<32x32xf32, #tpu.memory_space<vmem>>, vector<8x32xf32>
    %cst_24 = arith.constant dense<0.000000e+00> : vector<8x32xf32>
    %62 = tpu.matmul %60, %61, %cst_24 {dimension_numbers = #tpu.dot_dimension_numbers<[1], [0], [0], [1], [0, 0, 1, 1], [], []>} : vector<8x8xf32>, vector<8x32xf32>, vector<8x32xf32> -> vector<8x32xf32>
    %63 = arith.addf %45, %62 : vector<8x32xf32>
    %64 = vector.extract_strided_slice %6 {offsets = [0, 24], sizes = [8, 8], strides = [1, 1]} : vector<8x32xf32> to vector<8x8xf32>
    %65 = vector.extract_strided_slice %7 {offsets = [0, 24], sizes = [8, 8], strides = [1, 1]} : vector<8x32xf32> to vector<8x8xf32>
    %66 = vector.extract_strided_slice %8 {offsets = [0, 24], sizes = [8, 8], strides = [1, 1]} : vector<8x32xf32> to vector<8x8xf32>
    %cst_25 = arith.constant dense<0.000000e+00> : vector<8x8xf32>
    %67 = tpu.matmul %64, %65, %cst_25 {dimension_numbers = #tpu.dot_dimension_numbers<[1], [1], [0], [0], [0, 0, 1, 0], [], []>} : vector<8x8xf32>, vector<8x8xf32>, vector<8x8xf32> -> vector<8x8xf32>
    %cst_26 = arith.constant dense<0xFF800000> : vector<8xf32>
    %68 = vector.multi_reduction <maximumf>, %67, %cst_26 [1] : vector<8x8xf32> to vector<8xf32>
    %69 = vector.shape_cast %68 : vector<8xf32> to vector<8x1xf32>
    %70 = vector.broadcast %69 : vector<8x1xf32> to vector<8x8xf32>
    %71 = arith.subf %67, %70 : vector<8x8xf32>
    %72 = math.exp %71 : vector<8x8xf32>
    %cst_27 = arith.constant dense<0.000000e+00> : vector<8xf32>
    %73 = vector.multi_reduction <add>, %72, %cst_27 [1] : vector<8x8xf32> to vector<8xf32>
    %74 = vector.shape_cast %73 : vector<8xf32> to vector<8x1xf32>
    %75 = tpu.reciprocal %74 : vector<8x1xf32> -> vector<8x1xf32>
    %76 = vector.broadcast %75 : vector<8x1xf32> to vector<8x8xf32>
    %77 = arith.mulf %72, %76 : vector<8x8xf32>
    %cst_28 = arith.constant dense<0.000000e+00> : vector<8x8xf32>
    %78 = tpu.matmul %77, %66, %cst_28 {dimension_numbers = #tpu.dot_dimension_numbers<[1], [0], [0], [1], [0, 0, 1, 1], [], []>} : vector<8x8xf32>, vector<8x8xf32>, vector<8x8xf32> -> vector<8x8xf32>
    %c24 = arith.constant 24 : index
    %c0_29 = arith.constant 0 : index
    %79 = vector.load %arg4[%c24, %c0_29] : memref<32x32xf32, #tpu.memory_space<vmem>>, vector<8x32xf32>
    %cst_30 = arith.constant dense<0.000000e+00> : vector<8x32xf32>
    %80 = tpu.matmul %78, %79, %cst_30 {dimension_numbers = #tpu.dot_dimension_numbers<[1], [0], [0], [1], [0, 0, 1, 1], [], []>} : vector<8x8xf32>, vector<8x32xf32>, vector<8x32xf32> -> vector<8x32xf32>
    %81 = arith.addf %63, %80 : vector<8x32xf32>
    %c0_31 = arith.constant 0 : index
    %c0_32 = arith.constant 0 : index
    %82 = vector.load %arg5[%c0_31, %c0_32] : memref<1x32xf32, #tpu.memory_space<vmem>>, vector<1x32xf32>
    %83 = vector.broadcast %82 : vector<1x32xf32> to vector<8x32xf32>
    %84 = arith.addf %81, %83 : vector<8x32xf32>
    %c0_33 = arith.constant 0 : index
    %c0_34 = arith.constant 0 : index
    %85 = vector.load %arg6[%c0_33, %c0_34] : memref<8x32xf32, #tpu.memory_space<vmem>>, vector<8x32xf32>
    tpu.vector_store %arg6[%c0_33, %c0_34], %84 {strides = array<i32>} : memref<8x32xf32, #tpu.memory_space<vmem>>, vector<8x32xf32>,
    return
  }
  func.func @transform_0(%arg0: i32) -> (i32, i32) {
    %c0_i32 = arith.constant 0 : i32
    %c0_i32_0 = arith.constant 0 : i32
    return %arg0, %c0_i32 : i32, i32
  }
  func.func @transform_1(%arg0: i32) -> (i32, i32) {
    %c0_i32 = arith.constant 0 : i32
    %c0_i32_0 = arith.constant 0 : i32
    %c0_i32_1 = arith.constant 0 : i32
    return %c0_i32, %c0_i32_0 : i32, i32
  }
  func.func @transform_2(%arg0: i32) -> (i32, i32) {
    %c0_i32 = arith.constant 0 : i32
    %c0_i32_0 = arith.constant 0 : i32
    %c0_i32_1 = arith.constant 0 : i32
    return %c0_i32, %c0_i32_0 : i32, i32
  }
  func.func @transform_3(%arg0: i32) -> (i32, i32) {
    %c0_i32 = arith.constant 0 : i32
    %c0_i32_0 = arith.constant 0 : i32
    %c0_i32_1 = arith.constant 0 : i32
    return %c0_i32, %c0_i32_0 : i32, i32
  }
  func.func @transform_4(%arg0: i32) -> (i32, i32) {
    %c0_i32 = arith.constant 0 : i32
    %c0_i32_0 = arith.constant 0 : i32
    %c0_i32_1 = arith.constant 0 : i32
    return %c0_i32, %c0_i32_0 : i32, i32
  }
  func.func @transform_5(%arg0: i32) -> (i32, i32) {
    %c0_i32 = arith.constant 0 : i32
    %c0_i32_0 = arith.constant 0 : i32
    return %arg0, %c0_i32 : i32, i32
  }
}

</mosaic_0001>

<bundles_post_ra>
// kernel: tpu_custom_call.1
= control target key start
LH: loop header
LB: loop body
LE: loop exit
PB: predicated region body
PF: predicated region fallthrough
CT: control target
= control target key end

     0   :  { %10 = vsyncpa [#allocation3], 0  ;;  %s1369_s0 = inlined_call_operand.hbm [shape: f32[16,32], index: 0, kind: input, shape index: {}]   ;;  %s1370_s1 = inlined_call_operand.hbm [shape: f32[32,96], index: 1, kind: input, shape index: {}]   ;;  %s1371_s2 = inlined_call_operand.vmem [shape: f32[1,96], index: 2, kind: input, shape index: {}]   ;;  %s1372_s3 = inlined_call_operand.hbm [shape: f32[32,32], index: 3, kind: input, shape index: {}]   ;;  %s1373_s4 = inlined_call_operand.vmem [shape: f32[1,32], index: 4, kind: input, shape index: {}]   ;;  %s1374_s5 = inlined_call_operand.hbm [shape: f32[16,32], index: 5, kind: output, shape index: {}]  }
   0x1   :  { %12 = vsyncpa [#allocation3 + $0x1], 0 }
   0x2   :  { %13 = vsyncpa [#allocation6], 0 }
   0x3   :  { %14 = vsyncpa [#allocation4], 0 }
   0x4   :  { %16 = vsyncpa [#allocation4 + $0x1], 0  ;;  %s1167_s18 = smov 0   ;;  %s1169_s19 = smov 0  }
   0x5   :  { %s1171_s20 = smov 0   ;;  %s1173_s21 = smov 0  }
   0x6 LB: > { %s174_s24 = sshll.u32 %s1370_s1, 4  ;;  %s1191_s25 = sadd.s32 4294967295, %s1120_s21   ;;  %s1120_s21 = sphi %s1173_s21, %s1385_s21   ;;  %s1116_s20 = sphi %s1171_s20, %s1384_s20   ;;  %s1112_s19 = sphi %s1169_s19, %s1383_s19   ;;  %s1108_s18 = sphi %s1167_s18, %s1382_s18   ;;  %s175_s24 = int_to_ptr.hbm [resolvable:$true] %s174_s24 }
   0x7   : > { %p830_p0 = scmp.ge.s32.totalorder %s1120_s21, 1  ;;  %p43_p1 = scmp.eq.s32.totalorder %s1191_s25, 0 }
   0x8   : > { %p163_p2 = scmp.lt.s32.totalorder %s1120_s21, 3  ;;  %s1122_s27 = smov [#allocation5]  }
   0x9   : > { %s176_s28 = sshll.u32 %s1122_s27, 4  ;;  %s191_s6 = sshll.u32 %s1372_s3, 4  ;;  %s177_s28 = int_to_ptr.vmem [resolvable:$true] %s176_s28  ;;  %s192_s6 = int_to_ptr.hbm [resolvable:$true] %s191_s6 }
   0xa   : > { %p1196_p3 = pnand %p830_p0, %p163_p2  ;;  %s1123_s7 = smov [#allocation7]  }
   0xb   : > { %s193_s8 = sshll.u32 %s1123_s7, 4  ;;  %s1124_s9 = smov 128   ;;  %s194_s8 = int_to_ptr.vmem [resolvable:$true] %s193_s8 }
   0xc   : > { %p874_p4 = pneg %p1196_p3  ;;  %s1125_s10 = smov 8  }
   0xd   : > { %s829_s11 = sadd.s32 4294967294, %s1120_s21   ;;  %s1210_s12 = sadd.s32 1, %s1120_s21  }
   0xe   : > { %p875_p6 = pnand %p874_p4, %p43_p1  ;;  %s26_s13 = ssub.s32 %s1120_s21, %s1210_s12 }
   0xf   : > { %s29_s14 = sadd.s32 1, %s1116_s20  ;;  %p27_p7 = scmp.eq.s32.totalorder %s26_s13, 0 }
  0x10   : > { %877 = dma.hbm_to_vmem [thread:$0]  (!%p875_p6), %s175_s24, 512, %s177_s28, [#allocation6], %s1124_s9, %s1124_s9, %s1125_s10  }
  0x11   : > { %880 = dma.hbm_to_vmem [thread:$0]  (!%p875_p6), %s192_s6, 512, %s194_s8, [#allocation6], %s1124_s9, %s1124_s9, %s1125_s10  }
  0x12   : > { %p36_p8 = scmp.ne.s32.totalorder %s1116_s20, %s1112_s19  ;;  %p37_p9 = scmp.eq.s32.totalorder %s1120_s21, 0 }
  0x13   : > { %p42_p10 = scmp.ne.s32.totalorder %s1112_s19, %s1108_s18  ;;  %p150_p13 = scmp.eq.s32.totalorder %s1191_s25, 1 }
  0x14   : > { %s1221_s15 = scalar_select %p27_p7, %s1116_s20, %s29_s14  }
  0x15   : > { %p1223_p11 = por %p37_p9, %p36_p8  ;;  %p1229_p12 = por %p43_p1, %p42_p10 }
  0x16   : > { %p156_p0 = scmp.eq.s32.totalorder %s829_s11, 1  ;;  %p891_p2 = scmp.lt.s32.totalorder %s1120_s21, 2 }
  0x17   : > { %s210_s22 = sand.u32 1, %s1116_s20   ;;  %p1236_p4 = por %p150_p13, %p36_p8 }
  0x18   : > { %p1240_p6 = por %p156_p0, %p42_p10  ;;  %s834_s27 = sshll.u32 %s210_s22, 3 }
  0x19   : > { %s835_s28 = sshll.u32 %s1120_s21, 3  ;;  %s214_s7 = scalar_lea.vmem [#allocation2], %s834_s27 }
  0x1a   : > { %s218_s6 = scalar_lea.hbm %s1369_s0, %s835_s28  ;;  %s222_s8 = sshll.u32 %s214_s7, 4  ;;  %s223_s8 = int_to_ptr.vmem [resolvable:$true] %s222_s8 }
  0x1b   : > { %s220_s9 = sshll.u32 %s218_s6, 4  ;;  %p1250_p7 = pnand %p891_p2, %p1223_p11  ;;  %s221_s9 = int_to_ptr.hbm [resolvable:$true] %s220_s9 }
  0x1c   : > { %s211_s11 = scalar_lea.sflag [#allocation3], %s210_s22  ;;  %s1020_s13 = sshra.s32 %s221_s9, 4  ;;  %s1021_s13 = int_to_ptr.hbm [resolvable:$true] %s1020_s13 }
  0x1d   : > { %s1022_s14 = scalar_lea.hbm %s1021_s13, 8  ;;  %p1024_p9 = pneg %p1250_p7 }
  0x1e   : > { %p1023_p8 = scmp.ne.s32.totalorder %s1021_s13, %s1022_s14  ;;  %s1027_s29 = scalar_lea.hbm %s1369_s0, 16 }
  0x1f   : > { %p1028_p11 = scmp.lt.s32.totalorder %s1021_s13, %s1369_s0  ;;  %p1029_p0 = scmp.lt.s32.totalorder %s1027_s29, %s1022_s14 }
  0x20   : > { %p1025_p10 = pnand %p1024_p9, %p1023_p8 }
  0x21   : > { %p1030_p2 = por %p1029_p0, %p1028_p11 }
  0x22   : > { %p1026_p13 = pneg %p1025_p10 }
  0x24   : > { %p1031_p5 = pnand %p1030_p2, %p1026_p13 }
  0x26   : > { %1034 = shalt.err (!%p1031_p5)
}
  0x27   : > { %884 = dma.hbm_to_vmem [thread:$0]  (!%p1250_p7), %s221_s9, 128, %s223_s8, %s211_s11  }
  0x28   : > { %231 = sbr.rel (%p1196_p3) target bundleno = 1502 (0x5de), region = 40  ;;  %s1267_s22 = sand.u32 (!%p1196_p3), 1, %s1112_s19  }
  0x29   : > { %s837_s6 = sshll.u32 (!%p1196_p3), %s1267_s22, 3  ;;  %s234_s7 = scalar_lea.sflag (!%p1196_p3), [#allocation3], %s1267_s22 }
  0x2a   : > { %s237_s13 = scalar_lea.vmem (!%p1196_p3), [#allocation2], %s837_s6 }
  0x2d   : > { %1095 = dma.done.wait (%p1229_p12), %s234_s7, 128  }
  0x2e   : > { %1097 = vsyncadd (%p1229_p12), %s234_s7, 4294967168 }
  0x2f   : > { %1099 = dma.done.wait (%p43_p1), [#allocation6], 1024  }
  0x30   : > { %1101 = vsyncadd (%p43_p1), [#allocation6], 4294966272  ;;  %v279_v0 = vld [vmem:[#allocation5 + $0x18] sm:$0xff]  ;;  %v278_v1 = vld [vmem:[#allocation5 + $0x10] sm:$0xff]  ;;  %vm284_vm0 = vcmask 261120   ;;  %s1126_s8 = smov 88  }
  0x31   : > { %300 = vmatpush.msra.mxu0 %v279_v0  ;;  %v277_v2 = vld [vmem:[#allocation5 + $0x8] sm:$0xff]  ;;  %v276_v3 = vld [vmem:[#allocation5] sm:$0xff]  ;;  %v275_v4 = vld [vmem:[%s237_s13] sm:$0xff]  ;;  %s1127_s9 = smov 96   ;;  %s1128_s10 = smov 120   ;;  %vm311_vm1 = vcmask 64512  }
  0x32   : > { %v942_v5 = vld [vmem:[%s1371_s2] ss:$0 sm:$0xff]  ;;  %s1129_s11 = smov 72   ;;  %s1130_s14 = smov 104   ;;  %v386_v8 = vld [vmem:[#allocation7] sm:$0xff] }
  0x33   : > { %301 = vmatpush.msra.mxu0 %v278_v1  ;;  %s1131_s27 = smov 80   ;;  %s1132_s28 = smov 56  }
  0x34   : > { %s1133_s29 = smov 64   ;;  %s1134_s30 = smov 112  }
  0x35   : > { %302 = vmatpush.msra.mxu0 %v277_v2  ;;  %s1135_s16 = smov 40   ;;  %s1136_s7 = smov 48  }
  0x36   : > { %s859_s13 = sshll.u32 %s1191_s25, 3  ;;  %s725_s25 = scalar_lea.sflag [#allocation4], %s1267_s22 }
  0x37   : > { %303 = vmatpush.msra.mxu0 %v276_v3 }
  0x38   : > { %841 = vmatmul.msk.f32.vlgmr.msra.gmra.mxu0 %vm284_vm0, %v275_v4 }
  0xb5   : > { %v305_v6 = vpop.f32.mrf.mxu0 }
  0xb6   : > { %v1285_v7 = vadd.f32 %v942_v5, %v305_v6 }
  0xb8   : > { %389 = vrot.lane.b32.xlu2 %v1285_v7, %s1126_s8  ;;  %309 = vrot.lane.b32.xlu0 %v1285_v7, %s1127_s9  ;;  %s735_s8 = scalar_lea.hbm %s1374_s5, %s859_s13 }
  0xc0   : > { %387 = vrot.lane.b32.xlu2 %v1285_v7, %s1128_s10 }
  0xc8   : > { %617 = vrot.lane.b32.xlu2 %v1285_v7, %s1129_s11  ;;  %s274_s11 = scalar_lea.vmem [#allocation8], %s837_s6  ;;  %s1070_s6 = scalar_lea.hbm %s1374_s5, 16 }
  0xd0   : > { %615 = vrot.lane.b32.xlu2 %v1285_v7, %s1130_s14  ;;  %s737_s14 = sshll.u32 %s274_s11, 4  ;;  %s738_s14 = int_to_ptr.vmem [resolvable:$true] %s737_s14 }
  0xd8   : > { %514 = vrot.lane.b32.xlu2 %v1285_v7, %s1131_s27  ;;  %s739_s27 = sshll.u32 %s735_s8, 4  ;;  %s740_s27 = int_to_ptr.hbm [resolvable:$true] %s739_s27 }
 0x112   : > { %v390_v9 = vpop.permute.xlu2 %389 }
 0x113   : > { %845 = vmatpush.xpose.msk.msra.mxu3 %vm311_vm1, %v390_v9 }
 0x117   : > { %507 = vmatpush.msrb.mxu3 %v386_v8 }
 0x11a   : > { %v388_v10 = vpop.permute.xlu2 %387 }
 0x11b   : > { %846 = vmatmul.msk.f32.vlgmr.msra.gmra.mxu3 %vm311_vm1, %v388_v10 }
 0x122   : > { %v618_v11 = vpop.permute.xlu2 %617 }
 0x123   : > { %854 = vmatpush.xpose.msk.msra.mxu3 %vm311_vm1, %v618_v11 }
 0x12a   : > { %v616_v12 = vpop.permute.xlu2 %615  ;;  %v310_v13 = vpop.permute.xlu0 %309 }
 0x12b   : > { %842 = vmatpush.xpose.msk.msra.mxu1 %vm311_vm1, %v310_v13  ;;  %v465_v13 = vld [vmem:[#allocation7 + $0x8] sm:$0xff] }
 0x12e   : > { %843 = vmatmul.msk.f32.vlgmr.msra.gmra.mxu1 %vm311_vm1, %v1285_v7 }
 0x12f   : > { %484 = vmatpush.msrb.mxu1 %v465_v13 }
 0x132   : > { %v515_v14 = vpop.permute.xlu2 %514 }
 0x133   : > { %850 = vmatpush.xpose.msk.msrb.mxu0 %vm311_vm1, %v515_v14 }
 0x19e   : > { %v412_v15 = vpop.f32.mrf.mxu3 }
 0x19f   : > { %v415_v16 = vsel %vm311_vm1, %v412_v15, -inf }
 0x1a0   : > { %416 = vmax.xlane.f32.xlu2 %v415_v16 }
 0x1ab   : > { %v333_v17 = vpop.f32.mrf.mxu1 }
 0x1ac   : > { %v336_v18 = vsel %vm311_vm1, %v333_v17, -inf }
 0x1ad   : > { %337 = vmax.xlane.f32.xlu0 %v336_v18 }
 0x1b8   : > { %439 = vrot.lane.b32.xlu2 %v1285_v7, %s1132_s28  ;;  %s1064_s28 = sshra.s32 %s740_s27, 4  ;;  %s1065_s28 = int_to_ptr.hbm [resolvable:$true] %s1064_s28 }
 0x1b9   : > { %p1071_p12 = scmp.lt.s32.totalorder %s1065_s28, %s1374_s5 }
 0x213   : > { %v417_v31 = vpop.xlane.xlu2 %416 }
 0x214   : > { %v418_v43 = vsub.f32 %v412_v15, %v417_v31 }
 0x216   : > { %v419_v46 = vmul.f32 1.442695, %v418_v43 }
 0x21b   : > { %v440_v38 = vpop.permute.xlu2 %439 }
 0x220   : > { %v338_v19 = vpop.xlane.xlu0 %337 }
 0x221   : > { %v339_v20 = vsub.f32 %v333_v17, %v338_v19 }
 0x223   : > { %v340_v21 = vmul.f32 1.442695, %v339_v20 }
 0x225   : > { %944 = vpow2.f32 %v340_v21 }
 0x22b   : > { %v945_v22 = vpop.eup %944 }
 0x22c   : > { %v342_v23 = vsel %vm311_vm1, %v945_v22, 0.0 }
 0x22d   : > { %343 = vadd.xlane.f32.xlu1 %v342_v23 }
 0x246   : > { %360 = vrot.lane.b32.xlu1 %v1285_v7, %s1133_s29  ;;  %s1066_s29 = scalar_lea.hbm %s1065_s28, 8 }
 0x247   : > { %p1067_p1 = scmp.ne.s32.totalorder %s1065_s28, %s1066_s29  ;;  %p1072_p7 = scmp.lt.s32.totalorder %s1070_s6, %s1066_s29 }
 0x249   : > { %p1068_p3 = pnand %p1067_p1, %p1236_p4  ;;  %p1073_p8 = por %p1072_p7, %p1071_p12 }
 0x24b   : > { %p1069_p5 = pneg %p1068_p3 }
 0x24d   : > { %p1074_p9 = pnand %p1073_p8, %p1069_p5 }
 0x24e   : > { %512 = vrot.lane.b32.xlu1 %v1285_v7, %s1134_s30 }
 0x2a0   : > { %v344_v24 = vpop.xlane.xlu1 %343 }
 0x2a1   : > { %946 = vrcp.f32 %v344_v24  ;;  %v356_v30 = vand.u32 2147483648, %v344_v24  ;;  %vm350_vm3 = vweird.f32 %v344_v24  ;;  %v354_v32 = vand.u32 2147483647, %v344_v24 }
 0x2a2   : > { %948 = vpow2.f32 %v419_v46 }
 0x2a3   : > { %v357_v34 = vor.u32 1.1754944e-38, %v356_v30  ;;  %vm355_vm5 = vcmp.eq.f32.partialorder %v354_v32, 8.507059e+37 }
 0x2a7   : > { %v947_v25 = vpop.eup %946 }
 0x2a8   : > { %v346_v26 = vmul.f32 %v947_v25, %v344_v24  ;;  %vm351_vm2 = vweird.f32 %v947_v25  ;;  %v949_v52 = vpop.eup %948 }
 0x2a9   : > { %vm352_vm4 = vmor %vm350_vm3, %vm351_vm2  ;;  %v421_v53 = vsel %vm311_vm1, %v949_v52, 0.0 }
 0x2aa   : > { %v347_v27 = vsub.f32 1.0, %v346_v26 }
 0x2ac   : > { %v348_v28 = vmul.f32 %v947_v25, %v347_v27 }
 0x2ae   : > { %v349_v29 = vadd.f32 %v947_v25, %v348_v28 }
 0x2b0   : > { %v353_v33 = vsel %vm352_vm4, %v947_v25, %v349_v29 }
 0x2b1   : > { %v358_v35 = vsel %vm355_vm5, %v357_v34, %v353_v33 }
 0x2b2   : > { %v359_v37 = vmul.f32 %v945_v22, %v358_v35 }
 0x2b8   : > { %v361_v36 = vpop.permute.xlu1 %360 }
 0x2b9   : > { %381 = vmatpush.msra.mxu2 %v361_v36  ;;  %v693_v36 = vld [vmem:[#allocation7 + $0x18] sm:$0xff] }
 0x2ba   : > { %844 = vmatmul.msk.f32.vlgmr.msra.gmra.mxu2 %vm311_vm1, %v359_v37  ;;  %v590_v37 = vld [vmem:[#allocation7 + $0x10] sm:$0xff] }
 0x2bb   : > { %460 = vmatpush.msrb.mxu2 %v440_v38  ;;  %609 = vmatpush.msra.mxu1 %v590_v37 }
 0x2c0   : > { %v513_v39 = vpop.permute.xlu1 %512 }
 0x2c1   : > { %851 = vmatmul.msk.f32.vlgmr.msrb.gmra.mxu0 %vm311_vm1, %v513_v39 }
 0x33d   : > { %v383_v40 = vpop.f32.mrf.mxu2 }
 0x33e   : > { %849 = vmatmul.msk.f32.vlgmr.msrb.gmra.mxu3 %vm311_vm1, %v383_v40  ;;  %v537_v41 = vpop.f32.mrf.mxu0 }
 0x33f   : > { %v540_v42 = vsel %vm311_vm1, %v537_v41, -inf }
 0x340   : > { %541 = vmax.xlane.f32.xlu1 %v540_v42 }
 0x346   : > { %855 = vmatmul.msk.f32.vlgmr.msra.gmra.mxu3 %vm311_vm1, %v616_v12 }
 0x359   : > { %667 = vrot.lane.b32.xlu1 %v1285_v7, %s1135_s16 }
 0x3b3   : > { %v542_v45 = vpop.xlane.xlu1 %541 }
 0x3b4   : > { %v543_v47 = vsub.f32 %v537_v41, %v542_v45  ;;  %v943_v45 = vld [vmem:[%s1373_s4] ss:$0 sm:$0xff] }
 0x3b6   : > { %v544_v51 = vmul.f32 1.442695, %v543_v47 }
 0x3b8   : > { %950 = vpow2.f32 %v544_v51 }
 0x3be   : > { %v1316_v54 = vpop.eup %950 }
 0x3bf   : > { %v546_v55 = vsel %vm311_vm1, %v1316_v54, 0.0 }
 0x3c1   : > { %v1312_v44 = vpop.f32.mrf.mxu3 }
 0x3c9   : > { %v640_v48 = vpop.f32.mrf.mxu3 }
 0x3ca   : > { %v643_v49 = vsel %vm311_vm1, %v640_v48, -inf }
 0x3cb   : > { %644 = vmax.xlane.f32.xlu0 %v643_v49  ;;  %v668_v50 = vpop.permute.xlu1 %667 }
 0x3cc   : > { %688 = vmatpush.msra.mxu0 %v668_v50 }
 0x3d3   : > { %422 = vadd.xlane.f32.xlu0 %v421_v53 }
 0x3db   : > { %547 = vadd.xlane.f32.xlu0 %v546_v55 }
 0x43e   : > { %v645_v56 = vpop.xlane.xlu0 %644 }
 0x43f   : > { %v646_v57 = vsub.f32 %v640_v48, %v645_v56 }
 0x441   : > { %v647_v58 = vmul.f32 1.442695, %v646_v57 }
 0x443   : > { %952 = vpow2.f32 %v647_v58 }
 0x446   : > { %v423_v59 = vpop.xlane.xlu0 %422 }
 0x447   : > { %954 = vrcp.f32 %v423_v59  ;;  %v435_v1 = vand.u32 2147483648, %v423_v59  ;;  %v433_v3 = vand.u32 2147483647, %v423_v59  ;;  %vm429_vm7 = vweird.f32 %v423_v59 }
 0x449   : > { %v953_v60 = vpop.eup %952  ;;  %v436_v5 = vor.u32 1.1754944e-38, %v435_v1  ;;  %vm434_vm9 = vcmp.eq.f32.partialorder %v433_v3, 8.507059e+37 }
 0x44a   : > { %v649_v61 = vsel %vm311_vm1, %v953_v60, 0.0 }
 0x44b   : > { %650 = vadd.xlane.f32.xlu0 %v649_v61 }
 0x44d   : > { %v955_v62 = vpop.eup %954 }
 0x44e   : > { %v425_v63 = vmul.f32 %v955_v62, %v423_v59  ;;  %vm430_vm6 = vweird.f32 %v955_v62  ;;  %v548_v10 = vpop.xlane.xlu0 %547 }
 0x44f   : > { %vm431_vm8 = vmor %vm429_vm7, %vm430_vm6  ;;  %956 = vrcp.f32 %v548_v10  ;;  %v560_v20 = vand.u32 2147483648, %v548_v10  ;;  %vm554_vm11 = vweird.f32 %v548_v10  ;;  %v558_v22 = vand.u32 2147483647, %v548_v10 }
 0x450   : > { %v426_v0 = vsub.f32 1.0, %v425_v63 }
 0x451   : > { %v561_v26 = vor.u32 1.1754944e-38, %v560_v20  ;;  %vm559_vm15 = vcmp.eq.f32.partialorder %v558_v22, 8.507059e+37 }
 0x452   : > { %v427_v2 = vmul.f32 %v955_v62, %v426_v0 }
 0x454   : > { %v428_v4 = vadd.f32 %v955_v62, %v427_v2 }
 0x455   : > { %v957_v11 = vpop.eup %956 }
 0x456   : > { %v432_v6 = vsel %vm431_vm8, %v955_v62, %v428_v4  ;;  %v550_v12 = vmul.f32 %v957_v11, %v548_v10  ;;  %vm555_vm10 = vweird.f32 %v957_v11 }
 0x457   : > { %v437_v8 = vsel %vm434_vm9, %v436_v5, %v432_v6  ;;  %vm556_vm12 = vmor %vm554_vm11, %vm555_vm10 }
 0x458   : > { %v438_v9 = vmul.f32 %v949_v52, %v437_v8  ;;  %v551_v15 = vsub.f32 1.0, %v550_v12 }
 0x45a   : > { %847 = vmatmul.msk.f32.vlgmr.msrb.gmra.mxu2 %vm311_vm1, %v438_v9  ;;  %v552_v16 = vmul.f32 %v957_v11, %v551_v15 }
 0x45c   : > { %v553_v19 = vadd.f32 %v957_v11, %v552_v16 }
 0x45e   : > { %v557_v25 = vsel %vm556_vm12, %v957_v11, %v553_v19 }
 0x45f   : > { %564 = vrot.lane.b32.xlu0 %v1285_v7, %s1136_s7  ;;  %v562_v29 = vsel %vm559_vm15, %v561_v26, %v557_v25 }
 0x460   : > { %v563_v34 = vmul.f32 %v1316_v54, %v562_v29 }
 0x4be   : > { %v651_v14 = vpop.xlane.xlu0 %650 }
 0x4bf   : > { %958 = vrcp.f32 %v651_v14  ;;  %v663_v23 = vand.u32 2147483648, %v651_v14  ;;  %v661_v24 = vand.u32 2147483647, %v651_v14  ;;  %vm657_vm14 = vweird.f32 %v651_v14 }
 0x4c1   : > { %v664_v28 = vor.u32 1.1754944e-38, %v663_v23  ;;  %vm662_vm3 = vcmp.eq.f32.partialorder %v661_v24, 8.507059e+37 }
 0x4c5   : > { %v959_v17 = vpop.eup %958 }
 0x4c6   : > { %v653_v18 = vmul.f32 %v959_v17, %v651_v14  ;;  %vm658_vm13 = vweird.f32 %v959_v17 }
 0x4c7   : > { %vm659_vm2 = vmor %vm657_vm14, %vm658_vm13 }
 0x4c8   : > { %v654_v21 = vsub.f32 1.0, %v653_v18 }
 0x4ca   : > { %v655_v7 = vmul.f32 %v959_v17, %v654_v21 }
 0x4cc   : > { %v656_v27 = vadd.f32 %v959_v17, %v655_v7 }
 0x4ce   : > { %v660_v30 = vsel %vm659_vm2, %v959_v17, %v656_v27 }
 0x4cf   : > { %v665_v31 = vsel %vm662_vm3, %v664_v28, %v660_v30 }
 0x4d0   : > { %v666_v32 = vmul.f32 %v953_v60, %v665_v31 }
 0x4d1   : > { %v565_v33 = vpop.permute.xlu0 %564 }
 0x4d2   : > { %585 = vmatpush.msra.mxu2 %v565_v33  ;;  %856 = vmatmul.msk.f32.vlgmr.msra.gmra.mxu0 %vm311_vm1, %v666_v32 }
 0x4d3   : > { %852 = vmatmul.msk.f32.vlgmr.msra.gmra.mxu2 %vm311_vm1, %v563_v34 }
 0x4d4   : > { %712 = vmatpush.msrb.mxu2 %v693_v36 }
 0x4dd   : > { %v462_v35 = vpop.f32.mrf.mxu2 }
 0x4de   : > { %848 = vmatmul.msk.f32.vlgmr.msrb.gmra.mxu1 %vm311_vm1, %v462_v35 }
 0x54f   : > { %v690_v38 = vpop.f32.mrf.mxu0 }
 0x550   : > { %857 = vmatmul.msk.f32.vlgmr.msrb.gmra.mxu2 %vm311_vm1, %v690_v38 }
 0x556   : > { %v587_v39 = vpop.f32.mrf.mxu2 }
 0x557   : > { %853 = vmatmul.msk.f32.vlgmr.msra.gmra.mxu1 %vm311_vm1, %v587_v39 }
 0x55b   : > { %v486_v40 = vpop.f32.mrf.mxu1 }
 0x55c   : > { %v510_v41 = vadd.f32 %v1312_v44, %v486_v40 }
 0x5d3   : > { %v714_v46 = vpop.f32.mrf.mxu2 }
 0x5d4   : > { %v611_v42 = vpop.f32.mrf.mxu1 }
 0x5d5   : > { %v614_v43 = vadd.f32 %v611_v42, %v510_v41 }
 0x5d7   : > { %v717_v47 = vadd.f32 %v714_v46, %v614_v43 }
 0x5d9   : > { %v722_v48 = vadd.f32 %v943_v45, %v717_v47 }
 0x5db   : > { %723 = vst.msk [vmem:[%s274_s11] sm:$0xff] %vm284_vm0, %v722_v48 }
 0x5dc   : > { %1077 = shalt.err (!%p1074_p9)
}
 0x5dd   : > { %872 = dma.vmem_to_hbm [thread:$0]  (%p1236_p4), %s738_s14, 128, %s740_s27, %s725_s25  }
 0x5de PF: > { %s751_s22 = sand.u32 1, %s1108_s18   ;;  %p1381_p10 = scmp.ge.s32.totalorder %s1120_s21, 2 }
 0x5df   : > { %s752_s26 = scalar_lea.sflag [#allocation4], %s751_s22 }
 0x5e0   : > { %p886_p13 = pnand %p1381_p10, %p1240_p6 }
 0x5e2   : > { %p887_p11 = pneg %p886_p13 }
 0x5e4   : > { %1103 = dma.done.wait (%p887_p11), %s752_s26, 128  }
 0x5e5   : > { %1105 = vsyncadd (%p887_p11), %s752_s26, 4294967168  ;;  %p19_p0 = scmp.ge.s32.totalorder %s1210_s12, 4   ;;  %s1382_s18 = smov %s1112_s19 }
 0x5e6   : > { %s1383_s19 = smov %s1116_s20  ;;  %s1384_s20 = smov %s1221_s15 }
 0x5e7   : > { %s1385_s21 = smov %s1210_s12  ;;  %21 = sbr.rel (!%p19_p0) target bundleno = 6 (0x6), region = 93 }
 0x5ec   :  { %758 = vsyncpa [#allocation3], 1 }
 0x5ed   :  { %760 = vsyncpa [#allocation3 + $0x1], 1 }
 0x5ee   :  { %761 = vsyncpa [#allocation6], 1 }
 0x5ef   :  { %762 = vsyncpa [#allocation4], 1 }
 0x5f0   :  { %764 = vsyncpa [#allocation4 + $0x1], 1 }

</bundles_post_ra>
